<compile_context>
chip_gen: v5e
topology: v5e:2x2
jax: 0.10.0
libtpu: 0.0.40
codegen_flags: <defaults>
</compile_context>

<pallas_src>
import math

import jax
import jax.numpy as jnp
from jax.experimental import pallas as pl
from jax.experimental.pallas import tpu as pltpu


def _flatten_copy_kernel(x_ref, o_ref):
    # Straight copy of the current lane-dense (tm, L) tile.
    o_ref[...] = x_ref[...]


def pallas_flatten(x: jax.Array, new_length: int) -> jax.Array:
    """Equivalent of torch _Flatten(new_length).forward(x) == x.view(-1, new_length)."""
    total = math.prod(x.shape)
    assert total % new_length == 0, "total elements must be divisible by new_length"
    m = total // new_length

    # ---- Choose a lane-dense copy layout (R, L), independent of new_length.
    # L is the largest of these 128-multiples that divides the element count.
    L = None
    for cand in (4096, 2048, 1024, 512, 256, 128):
        if total % cand == 0:
            L = cand
            break
    if L is None:
        # TODO(synk): no 128-multiple factor of `total`; rare path falls back to
        # (m, new_length) layout and tolerates masked partial-lane stores.
        L = new_length
    R = total // L

    # Row-major flatten into the copy layout (same memory order as torch .view
    # on a contiguous tensor; pure metadata in XLA).
    x2d = jnp.reshape(x, (R, L))

    # ---- Byte-budget tile selection: ~2 MiB per block.
    dtype_bytes = jnp.dtype(x.dtype).itemsize
    target_tile_bytes = 2 * 1024 * 1024
    row_bytes = L * dtype_bytes
    tm = max(1, target_tile_bytes // row_bytes)
    if tm >= 32:
        tm = (tm // 32) * 32          # 32-row aligned: dense for f32/bf16/int8
    tm = min(tm, R)
    if tm != R and tm % 8 != 0:
        tm_aligned = (tm // 8) * 8    # keep the (8, 128) block constraint
        tm = tm_aligned if tm_aligned > 0 else R

    grid = (pl.cdiv(R, tm),)          # partial edge block handled by masking

    cost = pl.CostEstimate(
        flops=0,
        transcendentals=0,
        bytes_accessed=2 * total * dtype_bytes,  # read + write
    )

    out2d = pl.pallas_call(
        _flatten_copy_kernel,
        out_shape=jax.ShapeDtypeStruct((R, L), x.dtype),
        grid_spec=pltpu.PrefetchScalarGridSpec(
            num_scalar_prefetch=0,
            grid=grid,
            in_specs=[pl.BlockSpec((tm, L), lambda i: (i, 0))],
            out_specs=pl.BlockSpec((tm, L), lambda i: (i, 0)),
        ),
        compiler_params=pltpu.CompilerParams(
            dimension_semantics=("parallel",),
        ),
        cost_estimate=cost,
    )(x2d)

    # Final view to (m, new_length): free metadata reshape of contiguous data.
    return jnp.reshape(out2d, (m, new_length))


if __name__ == "__main__":
    key = jax.random.PRNGKey(0)
    # NCHW input, small shapes: batch=2, channels=4, spatial=16x16.
    x = jax.random.normal(key, (2, 4, 16, 16), dtype=jnp.float32)

    # new_length = C*H*W -> output shape (2, 1024), mirroring x.view(-1, 1024).
    new_length = 4 * 16 * 16
    y = pallas_flatten(x, new_length)
    y = jax.block_until_ready(y)

    # Correctness check against plain JAX reshape (same semantics as torch
    # .view on a contiguous tensor).
    ref = jnp.reshape(x, (-1, new_length))
    assert y.shape == (2, new_length)
    assert y.dtype == x.dtype
    assert bool(jnp.all(y == ref))

    print("KERNEL_OK")
</pallas_src>

<mosaic_0001>
module attributes {stable_mosaic.version = 11 : i64} {
  func.func @_flatten_copy_kernel(%arg0: i32, %arg1: memref<1x2048xf32, #tpu.memory_space<vmem>>, %arg2: memref<1x2048xf32, #tpu.memory_space<vmem>>) attributes {dimension_semantics = [#tpu.dimension_semantics<parallel>], iteration_bounds = array<i64: 1>, scalar_prefetch = 0 : i64, scratch_operands = 0 : i64, tpu.core_type = #tpu.core_type<tc>, window_params = [{transform_indices = @transform_0, window_bounds = array<i64: 1, 2048>}, {transform_indices = @transform_1, window_bounds = array<i64: 1, 2048>}]} {
    %c0 = arith.constant 0 : index
    %c0_0 = arith.constant 0 : index
    %0 = vector.load %arg1[%c0, %c0_0] : memref<1x2048xf32, #tpu.memory_space<vmem>>, vector<1x2048xf32>
    %c0_1 = arith.constant 0 : index
    %c0_2 = arith.constant 0 : index
    %1 = vector.load %arg2[%c0_1, %c0_2] : memref<1x2048xf32, #tpu.memory_space<vmem>>, vector<1x2048xf32>
    tpu.vector_store %arg2[%c0_1, %c0_2], %0 {strides = array<i32>} : memref<1x2048xf32, #tpu.memory_space<vmem>>, vector<1x2048xf32>,
    return
  }
  func.func @transform_0(%arg0: i32) -> (i32, i32) {
    %c0_i32 = arith.constant 0 : i32
    %c0_i32_0 = arith.constant 0 : i32
    return %arg0, %c0_i32 : i32, i32
  }
  func.func @transform_1(%arg0: i32) -> (i32, i32) {
    %c0_i32 = arith.constant 0 : i32
    %c0_i32_0 = arith.constant 0 : i32
    return %arg0, %c0_i32 : i32, i32
  }
}

</mosaic_0001>

<bundles_post_ra>
// kernel: tpu_custom_call.1
= control target key start
LH: loop header
LB: loop body
LE: loop exit
PB: predicated region body
PF: predicated region fallthrough
CT: control target
= control target key end

     0   :  { %6 = vsyncpa [#allocation3], 0  ;;  %s116_s0 = inlined_call_operand.hbm [shape: f32[1,2048], index: 0, kind: input, shape index: {}]   ;;  %s117_s1 = inlined_call_operand.hbm [shape: f32[1,2048], index: 1, kind: output, shape index: {}]  }
   0x1   :  { %7 = vsyncpa [#allocation4], 0  ;;  %s13_s8 = sshll.u32 %s116_s0, 4  ;;  %s98_s9 = smov [#allocation2]   ;;  %s14_s8 = int_to_ptr.hbm [resolvable:$true] %s13_s8 }
   0x2   :  { %s15_s10 = sshll.u32 %s98_s9, 4  ;;  %s16_s10 = int_to_ptr.vmem [resolvable:$true] %s15_s10 }
   0x3   :  { %18 = dma.hbm_to_vmem [thread:$0]  %s14_s8, 256, %s16_s10, [#allocation3]  }
   0x4   :  { %94 = dma.done.wait [#allocation3], 256  }
   0x5   :  { %95 = vsyncadd [#allocation3], 4294967040  ;;  %s99_s11 = smov [#allocation5]   ;;  %s34_s15 = sshll.u32 %s117_s1, 4  ;;  %v23_v0 = vld [vmem:[#allocation2] sm:$0xff]  ;;  %v24_v1 = vld [vmem:[#allocation2 + $0x8] sm:$0xff]  ;;  %s35_s15 = int_to_ptr.hbm [resolvable:$true] %s34_s15 }
   0x6   :  { %s32_s12 = sshll.u32 %s99_s11, 4  ;;  %25 = vst [vmem:[#allocation5] sm:$0xff] %v23_v0  ;;  %s33_s12 = int_to_ptr.vmem [resolvable:$true] %s32_s12 }
   0x7   :  { %26 = vst [vmem:[#allocation5 + $0x8] sm:$0xff] %v24_v1 }
   0x8   :  { %37 = dma.vmem_to_hbm [thread:$0]  %s33_s12, 256, %s35_s15, [#allocation4]  }
   0x9   :  { %96 = dma.done.wait [#allocation4], 256  }
   0xa   :  { %97 = vsyncadd [#allocation4], 4294967040 }
   0xb   :  { %42 = vsyncpa [#allocation3], 1 }
   0xc   :  { %43 = vsyncpa [#allocation4], 1 }

</bundles_post_ra>
